<compile_context>
chip_gen: v5e
topology: v5e:2x2
jax: 0.10.0
libtpu: 0.0.40
codegen_flags: <defaults>
</compile_context>

<pallas_src>
import functools

import jax
import jax.numpy as jnp
from jax.experimental import pallas as pl
from jax.experimental.pallas import tpu as pltpu


def text_encoder_kernel(x_ref, w1_ref, b1_ref, w2_ref, b2_ref, o_ref,
                        *, seq_len, seq_pad, batch_tile):
    # x_ref: (batch_tile * seq_pad, Din), rows ordered [b0s0..b0sSp-1, b1s0,..]
    # w1_ref: (Din, H)  b1_ref: (1, H)  w2_ref: (H, C)  b2_ref: (1, C)
    # o_ref: (batch_tile, C)

    # ---- linear1 (MXU, f32 accumulate) + bias + ReLU, all 2-D --------------
    h = jnp.dot(x_ref[...], w1_ref[...], preferred_element_type=jnp.float32)
    h = jnp.maximum(h + b1_ref[...].astype(jnp.float32), 0.0)  # (bt*Sp, H) f32

    # ---- max-pool over the sequence: free reshape + axis-1 max -------------
    hidden = h.shape[-1]
    h3 = h.reshape(batch_tile, seq_pad, hidden)                 # reinterpretation
    if seq_pad != seq_len:
        # Padded rows -> 0, the neutral element for a max of ReLU outputs.
        seq_ids = jax.lax.broadcasted_iota(jnp.int32, h3.shape, 1)
        h3 = jnp.where(seq_ids < seq_len, h3, 0.0)
    pooled = jnp.max(h3, axis=1)                                # (bt, H) f32

    # ---- linear2 (MXU, f32 accumulate) + bias -------------------------------
    y = jnp.dot(pooled.astype(w2_ref.dtype), w2_ref[...],
                preferred_element_type=jnp.float32)
    y = y + b2_ref[...].astype(jnp.float32)                     # (bt, C) f32

    # ---- L2 normalize via rsqrt (EUP); eps avoids 0/0 -> NaN ----------------
    sumsq = jnp.sum(y * y, axis=-1, keepdims=True)
    inv = jax.lax.rsqrt(jnp.maximum(sumsq, 1e-12))
    o_ref[...] = (y * inv).astype(o_ref.dtype)


def _tpu_config():
    """Per-generation tiling knobs: TensorCores sharing the 'parallel' grid
    axis, and a safe scoped-VMEM budget."""
    try:
        kind = jax.devices()[0].device_kind.lower()
    except Exception:
        kind = ""
    if "v7" in kind or "7x" in kind:
        # v7x: 2 TCs/chip, only 64 MiB physical VMEM per TC -> budget 48 MiB.
        return {"num_cores": 2, "vmem_limit": 48 * 1024 * 1024}
    # v5e / v6e (and older): 1 TC, 128 MiB physical VMEM.
    return {"num_cores": 1, "vmem_limit": 64 * 1024 * 1024}


def _pick_batch_tile(B, seq_pad, *, num_cores, target_rows=8192):
    """Largest batch tile with bt % 8 == 0 (or bt == B) and bt*seq_pad rows per
    grid step capped at target_rows. On multi-TC parts prefer a grid length
    that is a multiple of the core count so no TensorCore idles."""
    candidates = [bt for bt in range(8, B + 1, 8)
                  if B % bt == 0 and bt * seq_pad <= target_rows]
    if not candidates:
        return B  # tiny B: one full-extent block (block dims == array dims)
    if num_cores >= 2:
        even = [bt for bt in candidates if (B // bt) % num_cores == 0]
        if even:
            return max(even)
        multi = [bt for bt in candidates if B // bt >= num_cores]
        if multi:
            return max(multi)
    return max(candidates)


def text_encoder(x, w1_t, b1, w2_t, b2, *, batch_tile=None,
                 matmul_dtype="auto", target_rows=8192):
    """x: (B, S, Din). w1_t: (Din, H), b1: (1, H), w2_t: (H, C), b2: (1, C).
    Weights are stored pre-transposed as (in, out). Returns (B, C) f32."""
    B, S, Din = x.shape
    H = w1_t.shape[1]
    C = w2_t.shape[1]

    # Pad the sequence to a multiple of 8 sublanes; kernel masks padded rows.
    seq_pad = ((S + 7) // 8) * 8
    if seq_pad != S:
        x = jnp.pad(x, ((0, 0), (0, seq_pad - S), (0, 0)))

    cfg = _tpu_config()
    if batch_tile is None:
        batch_tile = _pick_batch_tile(B, seq_pad, num_cores=cfg["num_cores"],
                                      target_rows=target_rows)
    assert B % batch_tile == 0, f"batch_tile={batch_tile} must divide B={B}"
    grid_len = B // batch_tile

    # bf16 MXU operands by default at scale: the kernel is HBM-bound and the x
    # stream dominates bytes. Bias/ReLU/pool/normalize stay f32 in the kernel.
    if matmul_dtype == "auto":
        matmul_dtype = jnp.bfloat16 if B * seq_pad >= 4096 else None
    if matmul_dtype is not None:
        x = x.astype(matmul_dtype)
        w1_t = w1_t.astype(matmul_dtype)
        w2_t = w2_t.astype(matmul_dtype)
    b1 = b1.astype(jnp.float32)
    b2 = b2.astype(jnp.float32)

    # Free row-major reshape in HBM; the kernel never reshapes across tiles.
    x_flat = x.reshape(B * seq_pad, Din)

    # 3-deep buffering on the x stream only pays off with enough grid steps.
    x_spec_kwargs = {}
    if grid_len >= 3:
        x_spec_kwargs["pipeline_mode"] = pl.Buffered(3)

    kernel = functools.partial(text_encoder_kernel, seq_len=S,
                               seq_pad=seq_pad, batch_tile=batch_tile)

    return pl.pallas_call(
        kernel,
        out_shape=jax.ShapeDtypeStruct((B, C), jnp.float32),
        grid_spec=pltpu.PrefetchScalarGridSpec(
            num_scalar_prefetch=0,
            grid=(grid_len,),
            in_specs=[
                pl.BlockSpec((batch_tile * seq_pad, Din), lambda i: (i, 0),
                             **x_spec_kwargs),
                pl.BlockSpec((Din, H), lambda i: (0, 0)),
                pl.BlockSpec((1, H), lambda i: (0, 0)),
                pl.BlockSpec((H, C), lambda i: (0, 0)),
                pl.BlockSpec((1, C), lambda i: (0, 0)),
            ],
            out_specs=pl.BlockSpec((batch_tile, C), lambda i: (i, 0)),
        ),
        compiler_params=pltpu.CompilerParams(
            dimension_semantics=("parallel",),
            vmem_limit_bytes=cfg["vmem_limit"],
        ),
    )(x_flat, w1_t, b1, w2_t, b2)


def reference(x, w1_t, b1, w2_t, b2):
    B, S, Din = x.shape
    xf = x.reshape(-1, Din)
    h = jnp.maximum(xf @ w1_t + b1, 0.0)
    h = h.reshape(B, S, -1)
    pooled = jnp.max(h, axis=1)
    y = pooled @ w2_t + b2
    return y / jnp.sqrt(jnp.sum(y * y, axis=-1, keepdims=True))


if __name__ == "__main__":
    # Config consistent with the module:
    #   sigurdsson_hid_size=32, hidden_size=32, contrastive_size=16
    B, S = 2, 8
    D_IN, HIDDEN, CONTRASTIVE = 32, 32, 16

    key = jax.random.PRNGKey(0)
    kx, kw1, kb1, kw2, kb2, kx2 = jax.random.split(key, 6)

    x = jax.random.normal(kx, (B, S, D_IN), dtype=jnp.float32)

    # PyTorch nn.Linear init: U(-1/sqrt(fan_in), 1/sqrt(fan_in)); stored
    # (out, in) in torch, pre-transposed here to (in, out) for the kernel.
    bound1 = 1.0 / jnp.sqrt(jnp.float32(D_IN))
    w1_t = jax.random.uniform(kw1, (D_IN, HIDDEN), jnp.float32, -bound1, bound1)
    b1 = jax.random.uniform(kb1, (1, HIDDEN), jnp.float32, -bound1, bound1)

    bound2 = 1.0 / jnp.sqrt(jnp.float32(HIDDEN))
    w2_t = jax.random.uniform(kw2, (HIDDEN, CONTRASTIVE), jnp.float32, -bound2, bound2)
    b2 = jax.random.uniform(kb2, (1, CONTRASTIVE), jnp.float32, -bound2, bound2)

    ref = jax.block_until_ready(reference(x, w1_t, b1, w2_t, b2))

    # Full-precision path: must match the reference tightly.
    out = jax.block_until_ready(
        text_encoder(x, w1_t, b1, w2_t, b2, matmul_dtype=None))
    assert out.shape == (B, CONTRASTIVE), out.shape
    assert jnp.allclose(out, ref, atol=1e-5, rtol=1e-5), \
        float(jnp.max(jnp.abs(out - ref)))

    # S % 8 != 0 path (wrapper padding + in-kernel masking): tight check.
    B2, S2 = 4, 5
    x2 = jax.random.normal(kx2, (B2, S2, D_IN), dtype=jnp.float32)
    ref2 = jax.block_until_ready(reference(x2, w1_t, b1, w2_t, b2))
    out2 = jax.block_until_ready(
        text_encoder(x2, w1_t, b1, w2_t, b2, matmul_dtype=None))
    assert out2.shape == (B2, CONTRASTIVE), out2.shape
    assert jnp.allclose(out2, ref2, atol=1e-5, rtol=1e-5), \
        float(jnp.max(jnp.abs(out2 - ref2)))

    # Reduced-precision MXU-operand path (the at-scale default): loose check.
    out_bf16 = jax.block_until_ready(
        text_encoder(x, w1_t, b1, w2_t, b2, matmul_dtype=jnp.bfloat16))
    assert bool(jnp.all(jnp.isfinite(out_bf16)))
    assert jnp.allclose(out_bf16, ref, atol=5e-2), \
        float(jnp.max(jnp.abs(out_bf16 - ref)))

    print("KERNEL_OK")
</pallas_src>

<mosaic_0001>
module attributes {stable_mosaic.version = 11 : i64} {
  func.func @text_encoder_kernel(%arg0: i32, %arg1: memref<16x32xf32, #tpu.memory_space<vmem>>, %arg2: memref<32x32xf32, #tpu.memory_space<vmem>>, %arg3: memref<1x32xf32, #tpu.memory_space<vmem>>, %arg4: memref<32x16xf32, #tpu.memory_space<vmem>>, %arg5: memref<1x16xf32, #tpu.memory_space<vmem>>, %arg6: memref<2x16xf32, #tpu.memory_space<vmem>>) attributes {dimension_semantics = [#tpu.dimension_semantics<parallel>], iteration_bounds = array<i64: 1>, scalar_prefetch = 0 : i64, scratch_operands = 0 : i64, tpu.core_type = #tpu.core_type<tc>, window_params = [{transform_indices = @transform_0, window_bounds = array<i64: 16, 32>}, {pipeline_mode = #tpu.pipeline_mode<synchronous>, transform_indices = @transform_1, window_bounds = array<i64: 32, 32>}, {pipeline_mode = #tpu.pipeline_mode<synchronous>, transform_indices = @transform_2, window_bounds = array<i64: 1, 32>}, {pipeline_mode = #tpu.pipeline_mode<synchronous>, transform_indices = @transform_3, window_bounds = array<i64: 32, 16>}, {pipeline_mode = #tpu.pipeline_mode<synchronous>, transform_indices = @transform_4, window_bounds = array<i64: 1, 16>}, {transform_indices = @transform_5, window_bounds = array<i64: 2, 16>}]} {
    %c0 = arith.constant 0 : index
    %c0_0 = arith.constant 0 : index
    %0 = vector.load %arg1[%c0, %c0_0] : memref<16x32xf32, #tpu.memory_space<vmem>>, vector<16x32xf32>
    %c0_1 = arith.constant 0 : index
    %c0_2 = arith.constant 0 : index
    %1 = vector.load %arg2[%c0_1, %c0_2] : memref<32x32xf32, #tpu.memory_space<vmem>>, vector<32x32xf32>
    %cst = arith.constant dense<0.000000e+00> : vector<16x32xf32>
    %2 = tpu.matmul %0, %1, %cst {dimension_numbers = #tpu.dot_dimension_numbers<[1], [0], [0], [1], [0, 0, 1, 1], [], []>} : vector<16x32xf32>, vector<32x32xf32>, vector<16x32xf32> -> vector<16x32xf32>
    %c0_3 = arith.constant 0 : index
    %c0_4 = arith.constant 0 : index
    %3 = vector.load %arg3[%c0_3, %c0_4] : memref<1x32xf32, #tpu.memory_space<vmem>>, vector<1x32xf32>
    %4 = vector.broadcast %3 : vector<1x32xf32> to vector<16x32xf32>
    %5 = arith.addf %2, %4 : vector<16x32xf32>
    %cst_5 = arith.constant 0.000000e+00 : f32
    %6 = vector.broadcast %cst_5 : f32 to vector<16x32xf32>
    %7 = arith.maximumf %5, %6 : vector<16x32xf32>
    %8 = vector.shape_cast %7 : vector<16x32xf32> to vector<2x8x32xf32>
    %cst_6 = arith.constant dense<0xFF800000> : vector<2x32xf32>
    %9 = vector.multi_reduction <maximumf>, %8, %cst_6 [1] : vector<2x8x32xf32> to vector<2x32xf32>
    %c0_7 = arith.constant 0 : index
    %c0_8 = arith.constant 0 : index
    %10 = vector.load %arg4[%c0_7, %c0_8] : memref<32x16xf32, #tpu.memory_space<vmem>>, vector<32x16xf32>
    %cst_9 = arith.constant dense<0.000000e+00> : vector<2x16xf32>
    %11 = tpu.matmul %9, %10, %cst_9 {dimension_numbers = #tpu.dot_dimension_numbers<[1], [0], [0], [1], [0, 0, 1, 1], [], []>} : vector<2x32xf32>, vector<32x16xf32>, vector<2x16xf32> -> vector<2x16xf32>
    %c0_10 = arith.constant 0 : index
    %c0_11 = arith.constant 0 : index
    %12 = vector.load %arg5[%c0_10, %c0_11] : memref<1x16xf32, #tpu.memory_space<vmem>>, vector<1x16xf32>
    %13 = vector.broadcast %12 : vector<1x16xf32> to vector<2x16xf32>
    %14 = arith.addf %11, %13 : vector<2x16xf32>
    %15 = arith.mulf %14, %14 : vector<2x16xf32>
    %cst_12 = arith.constant dense<0.000000e+00> : vector<2xf32>
    %16 = vector.multi_reduction <add>, %15, %cst_12 [1] : vector<2x16xf32> to vector<2xf32>
    %17 = vector.shape_cast %16 : vector<2xf32> to vector<2x1xf32>
    %cst_13 = arith.constant 9.99999996E-13 : f32
    %18 = vector.broadcast %cst_13 : f32 to vector<2x1xf32>
    %19 = arith.maximumf %17, %18 : vector<2x1xf32>
    %20 = math.rsqrt %19 : vector<2x1xf32>
    %21 = vector.broadcast %20 : vector<2x1xf32> to vector<2x16xf32>
    %22 = arith.mulf %14, %21 : vector<2x16xf32>
    %c0_14 = arith.constant 0 : index
    %c0_15 = arith.constant 0 : index
    %23 = vector.load %arg6[%c0_14, %c0_15] : memref<2x16xf32, #tpu.memory_space<vmem>>, vector<2x16xf32>
    tpu.vector_store %arg6[%c0_14, %c0_15], %22 {strides = array<i32>} : memref<2x16xf32, #tpu.memory_space<vmem>>, vector<2x16xf32>,
    return
  }
  func.func @transform_0(%arg0: i32) -> (i32, i32) {
    %c0_i32 = arith.constant 0 : i32
    %c0_i32_0 = arith.constant 0 : i32
    return %arg0, %c0_i32 : i32, i32
  }
  func.func @transform_1(%arg0: i32) -> (i32, i32) {
    %c0_i32 = arith.constant 0 : i32
    %c0_i32_0 = arith.constant 0 : i32
    %c0_i32_1 = arith.constant 0 : i32
    return %c0_i32, %c0_i32_0 : i32, i32
  }
  func.func @transform_2(%arg0: i32) -> (i32, i32) {
    %c0_i32 = arith.constant 0 : i32
    %c0_i32_0 = arith.constant 0 : i32
    %c0_i32_1 = arith.constant 0 : i32
    return %c0_i32, %c0_i32_0 : i32, i32
  }
  func.func @transform_3(%arg0: i32) -> (i32, i32) {
    %c0_i32 = arith.constant 0 : i32
    %c0_i32_0 = arith.constant 0 : i32
    %c0_i32_1 = arith.constant 0 : i32
    return %c0_i32, %c0_i32_0 : i32, i32
  }
  func.func @transform_4(%arg0: i32) -> (i32, i32) {
    %c0_i32 = arith.constant 0 : i32
    %c0_i32_0 = arith.constant 0 : i32
    %c0_i32_1 = arith.constant 0 : i32
    return %c0_i32, %c0_i32_0 : i32, i32
  }
  func.func @transform_5(%arg0: i32) -> (i32, i32) {
    %c0_i32 = arith.constant 0 : i32
    %c0_i32_0 = arith.constant 0 : i32
    return %arg0, %c0_i32 : i32, i32
  }
}

</mosaic_0001>

<bundles_post_ra>
// kernel: tpu_custom_call.1
= control target key start
LH: loop header
LB: loop body
LE: loop exit
PB: predicated region body
PF: predicated region fallthrough
CT: control target
= control target key end

     0   :  { %s260_s0 = inlined_call_operand.vmem [shape: f32[16,32], index: 0, kind: input, shape index: {}]   ;;  %s261_s1 = inlined_call_operand.vmem [shape: f32[32,32], index: 1, kind: input, shape index: {}]   ;;  %s262_s2 = inlined_call_operand.vmem [shape: f32[1,32], index: 2, kind: input, shape index: {}]   ;;  %s263_s3 = inlined_call_operand.vmem [shape: f32[32,16], index: 3, kind: input, shape index: {}]   ;;  %s264_s4 = inlined_call_operand.vmem [shape: f32[1,16], index: 4, kind: input, shape index: {}]   ;;  %s265_s5 = inlined_call_operand.hbm [shape: f32[2,16], index: 5, kind: output, shape index: {}]  }
   0x1   :  { %v26_v0 = vld [vmem:[%s261_s1 + $0x18] sm:$0xff]  ;;  %v25_v1 = vld [vmem:[%s261_s1 + $0x10] sm:$0xff]  ;;  %v24_v2 = vld [vmem:[%s261_s1 + $0x8] sm:$0xff] }
   0x2   :  { %50 = vmatpush.msra.mxu0 %v26_v0  ;;  %148 = vmatpush.msra.mxu2 %v26_v0 }
   0x4   :  { %51 = vmatpush.msra.mxu0 %v25_v1  ;;  %149 = vmatpush.msra.mxu2 %v25_v1 }
   0x5   :  { %10 = vsyncpa [#allocation3], 0  ;;  %v23_v3 = vld [vmem:[%s261_s1] sm:$0xff]  ;;  %vm31_vm0 = vcmask 261120   ;;  %v22_v5 = vld [vmem:[%s260_s0 + $0x8] sm:$0xff]  ;;  %vm87_vm1 = vcmask 1041409  }
   0x6   :  { %52 = vmatpush.msra.mxu0 %v24_v2  ;;  %150 = vmatpush.msra.mxu2 %v24_v2  ;;  %v21_v4 = vld [vmem:[%s260_s0] sm:$0xff]  ;;  %v80_v6 = vld [vmem:[%s263_s3 + $0x18] sm:$0xff]  ;;  %v79_v7 = vld [vmem:[%s263_s3 + $0x10] sm:$0xff]  ;;  %vm112_vm2 = vcmask 123904   ;;  %s183_s13 = smov [#allocation2]   ;;  %s136_s16 = sshll.u32 %s265_s5, 4  ;;  %s137_s16 = int_to_ptr.hbm [resolvable:$true] %s136_s16 }
   0x7   :  { %103 = vmatpush.msra.mxu1 %v80_v6  ;;  %v78_v8 = vld [vmem:[%s263_s3 + $0x8] sm:$0xff]  ;;  %v77_v9 = vld [vmem:[%s263_s3] sm:$0xff] }
   0x8   :  { %53 = vmatpush.msra.mxu0 %v23_v3  ;;  %151 = vmatpush.msra.mxu2 %v23_v3  ;;  %v153_v10 = vld [vmem:[%s262_s2] ss:$0 sm:$0xff] }
   0x9   :  { %145 = vmatmul.msk.f32.vlgmr.msra.gmra.mxu0 %vm31_vm0, %v21_v4  ;;  %146 = vmatmul.msk.f32.vlgmr.msra.gmra.mxu2 %vm31_vm0, %v22_v5  ;;  %v154_v32 = vld [vmem:[%s264_s4] ss:$0 sm:$0xff]  ;;  %s134_s4 = sshll.u32 %s183_s13, 4  ;;  %s135_s4 = int_to_ptr.vmem [resolvable:$true] %s134_s4 }
   0xa   :  { %104 = vmatpush.msra.mxu1 %v79_v7 }
   0xc   :  { %105 = vmatpush.msra.mxu1 %v78_v8 }
   0xe   :  { %106 = vmatpush.msra.mxu1 %v77_v9 }
  0x86   :  { %v55_v11 = vpop.f32.mrf.mxu0 }
  0x87   :  { %v56_v12 = vadd.f32 %v153_v10, %v55_v11 }
  0x89   :  { %v61_v13 = vmax.f32 %v56_v12, 0.0 }
  0x8b   :  { %v63_v14 = vsel %vm31_vm0, %v61_v13, -inf }
  0x8c   :  { %v64_v15 = vrot.slane %v63_v14, 4  ;;  %v58_v16 = vpop.f32.mrf.mxu2 }
  0x8d   :  { %v59_v17 = vadd.f32 %v153_v10, %v58_v16 }
  0x8e   :  { %v65_v18 = vmax.f32 %v63_v14, %v64_v15 }
  0x8f   :  { %v62_v19 = vmax.f32 %v59_v17, 0.0 }
  0x90   :  { %v66_v20 = vrot.slane %v65_v18, 2 }
  0x91   :  { %v70_v21 = vsel %vm31_vm0, %v62_v19, -inf }
  0x92   :  { %v71_v22 = vrot.slane %v70_v21, 4  ;;  %v67_v23 = vmax.f32 %v65_v18, %v66_v20 }
  0x94   :  { %v72_v24 = vmax.f32 %v70_v21, %v71_v22  ;;  %v68_v26 = vrot.slane %v67_v23, 1 }
  0x96   :  { %v73_v25 = vrot.slane %v72_v24, 2  ;;  %v69_v29 = vmax.f32 %v67_v23, %v68_v26 }
  0x98   :  { %v74_v27 = vmax.f32 %v72_v24, %v73_v25 }
  0x9a   :  { %v75_v28 = vrot.slane %v74_v27, 1 }
  0x9c   :  { %v76_v30 = vmax.f32 %v74_v27, %v75_v28 }
  0x9e   :  { %v88_v31 = vsel %vm87_vm1, %v76_v30, %v69_v29 }
  0x9f   :  { %147 = vmatmul.msk.f32.vlgmr.msra.gmra.mxu1 %vm31_vm0, %v88_v31 }
 0x11c   :  { %v108_v33 = vpop.f32.mrf.mxu1 }
 0x11d   :  { %v109_v34 = vadd.f32 %v154_v32, %v108_v33 }
 0x11f   :  { %v111_v35 = vmul.f32 %v109_v34, %v109_v34 }
 0x121   :  { %v113_v36 = vsel %vm112_vm2, %v111_v35, 0.0 }
 0x122   :  { %114 = vadd.xlane.f32.xlu0 %v113_v36 }
 0x195   :  { %v115_v37 = vpop.xlane.xlu0 %114 }
 0x196   :  { %v116_v38 = vmax.f32 %v115_v37, 1e-12 }
 0x198   :  { %155 = vrsqrt.f32 %v116_v38  ;;  %vm123_vm4 = vweird.f32 %v116_v38 }
 0x19e   :  { %v156_v39 = vpop.eup %155 }
 0x19f   :  { %v118_v40 = vmul.f32 %v156_v39, %v116_v38  ;;  %vm124_vm3 = vweird.f32 %v156_v39 }
 0x1a0   :  { %vm125_vm5 = vmor %vm123_vm4, %vm124_vm3 }
 0x1a1   :  { %v119_v41 = vmul.f32 %v156_v39, %v118_v40 }
 0x1a3   :  { %v120_v42 = vmul.f32 0.5, %v119_v41 }
 0x1a5   :  { %v121_v43 = vsub.f32 1.5, %v120_v42 }
 0x1a7   :  { %v122_v44 = vmul.f32 %v156_v39, %v121_v43 }
 0x1a9   :  { %v126_v45 = vsel %vm125_vm5, %v156_v39, %v122_v44 }
 0x1aa   :  { %v127_v46 = vmul.f32 %v126_v45, %v109_v34 }
 0x1ac   :  { %128 = vst.msk [vmem:[#allocation2] sm:$0x3] %vm112_vm2, %v127_v46 }
 0x1ad   :  { %139 = dma.vmem_to_hbm [thread:$0]  %s135_s4, 32, %s137_s16, [#allocation3]  }
 0x1ae   :  { %181 = dma.done.wait [#allocation3], 32  }
 0x1af   :  { %182 = vsyncadd [#allocation3], 4294967264 }
 0x1b0   :  { %144 = vsyncpa [#allocation3], 1 }

</bundles_post_ra>
